<compile_context>
chip_gen: v7x
topology: tpu7x:2x2x1
jax: 0.10.0
libtpu: 0.0.40
codegen_flags: <defaults>
</compile_context>

<pallas_src>
import functools

import jax
import jax.numpy as jnp
from jax.experimental import pallas as pl
from jax.experimental.pallas import tpu as pltpu


# ---------------------------------------------------------------------------
# Variant A: one (Bt, C, HW) tile per grid step (small / medium feature maps).
# ---------------------------------------------------------------------------
def _ca_single_pass_kernel(x_ref, w1t_ref, w2t_ref, o_ref, *, inv_hw):
    # x_ref: (Bt, C, HW)   w1t_ref: (C, hidden)   w2t_ref: (hidden, C)   o_ref: (Bt, C, HW)
    xf = x_ref[...].astype(jnp.float32)              # f32 only for the pooled reductions
    bt = xf.shape[0]
    sums = jnp.sum(xf, axis=2)                       # (Bt, C)  lane reduction
    maxs = jnp.max(xf, axis=2)                       # (Bt, C)
    avgs = sums * inv_hw                              # precomputed 1/HW, no divide

    # One fused MLP pass for both poolings and all Bt batches: rows = [avg_*, max_*].
    pooled = jnp.concatenate([avgs, maxs], axis=0)   # (2*Bt, C)
    h = jnp.maximum(jnp.dot(pooled, w1t_ref[...], preferred_element_type=jnp.float32), 0.0)
    y = jax.nn.sigmoid(jnp.dot(h, w2t_ref[...], preferred_element_type=jnp.float32))

    # sigmoid(fc(avg)) + sigmoid(fc(max)); cast the (tiny) scale down and re-read x in its
    # native dtype so no f32 tile copy is kept live across the serial MLP chain.
    scale = (y[:bt] + y[bt:]).astype(o_ref.dtype)    # (Bt, C)
    o_ref[...] = x_ref[...] * scale[:, :, None]      # lane-dense full-tile store


# ---------------------------------------------------------------------------
# Variant B: HW-tiled two-pass (phase 0: pooled stats, phase 1: scale) for
# feature maps whose (1, C, HW) tile overflows the per-tile VMEM budget.
# ---------------------------------------------------------------------------
def _ca_two_pass_kernel(x_ref, w1t_ref, w2t_ref, o_ref,
                        sum_sc, max_sc, scale_sc, *, inv_hw, hw_true, hw_tile, padded):
    # x_ref/o_ref: (1, C, hw_tile); scratch: (1, C) running sum / running max / scale.
    ph = pl.program_id(1)
    h = pl.program_id(2)

    @pl.when(jnp.logical_and(ph == 0, h == 0))
    def _init():
        sum_sc[...] = jnp.zeros(sum_sc.shape, sum_sc.dtype)
        max_sc[...] = jnp.full(max_sc.shape, -jnp.inf, max_sc.dtype)

    @pl.when(ph == 0)
    def _accumulate():
        xf = x_ref[...].astype(jnp.float32)
        if padded:   # static: mask padded lanes out of the max (zero-pad is fine for the sum)
            lane = jax.lax.broadcasted_iota(jnp.int32, xf.shape, 2)
            xm = jnp.where(h * hw_tile + lane < hw_true, xf, -jnp.inf)
        else:
            xm = xf
        sum_sc[...] += jnp.sum(xf, axis=2)
        max_sc[...] = jnp.maximum(max_sc[...], jnp.max(xm, axis=2))

    @pl.when(jnp.logical_and(ph == 1, h == 0))
    def _mlp():
        bt = sum_sc.shape[0]
        avgs = sum_sc[...] * inv_hw
        pooled = jnp.concatenate([avgs, max_sc[...]], axis=0)          # (2, C)
        hid = jnp.maximum(jnp.dot(pooled, w1t_ref[...], preferred_element_type=jnp.float32), 0.0)
        y = jax.nn.sigmoid(jnp.dot(hid, w2t_ref[...], preferred_element_type=jnp.float32))
        scale_sc[...] = y[:bt] + y[bt:]

    @pl.when(ph == 1)
    def _scale():
        o_ref[...] = x_ref[...] * scale_sc[...].astype(o_ref.dtype)[:, :, None]


def _largest_divisor_leq(n, cap):
    d = max(1, min(n, cap))
    while n % d:
        d -= 1
    return d


def channel_attention(x, w1, w2, *, batch_tile=None, hw_tile=None,
                      vmem_limit_bytes=None, two_pass=None):
    """x: (B, C, H, W); w1: (hidden, C) = fc[0].weight; w2: (C, hidden) = fc[2].weight."""
    B, C, H, W = x.shape
    HW = H * W
    hidden = w1.shape[0]
    itemsize = jnp.dtype(x.dtype).itemsize

    # Generation-aware VMEM budgets (v7x: 64 MiB/TC physical vs 128 MiB on v5e/v6e).
    try:
        vmem_cap = int(pltpu.get_tpu_info().vmem_capacity_bytes)
    except Exception:  # interpret mode / non-TPU backend
        vmem_cap = 128 << 20
    if vmem_limit_bytes is None:
        vmem_limit_bytes = min(64 << 20, (vmem_cap * 3) // 4)   # 48 MiB on v7x, 64 MiB otherwise
    tile_budget = min(8 << 20, vmem_cap // 12)                  # ~5.3 MiB on v7x, 8 MiB otherwise

    # Transpose weights once on the host so the in-kernel matmuls keep C on lanes.
    w1t = w1.T                                        # (C, hidden)
    w2t = w2.T                                        # (hidden, C)

    x_flat = x.reshape(B, C, HW)
    bytes_per_batch = C * HW * itemsize
    inv_hw = 1.0 / HW
    if two_pass is None:
        two_pass = bytes_per_batch > tile_budget

    if not two_pass:
        # -------- Variant A: single pass, batch-tiled grid --------
        if batch_tile is None:
            # Keep >= 4 grid steps when B allows (DMA/compute pipelining + v7x dual-TC
            # sharding of the "parallel" batch axis), within the per-tile VMEM budget.
            target_steps = min(B, 4)
            cap = min(max(1, tile_budget // bytes_per_batch), max(1, B // target_steps))
            batch_tile = _largest_divisor_leq(B, cap)
        Bt = batch_tile
        assert B % Bt == 0, "batch_tile must divide B"
        # TODO(synk): when H*W is not a multiple of 128 the big store uses masked vst.msk;
        # folding a factor of C into the lane dim would make it unmasked at extra layout cost.

        kernel = functools.partial(_ca_single_pass_kernel, inv_hw=inv_hw)
        cost = pl.CostEstimate(
            flops=3 * B * C * HW + 8 * B * C * hidden,
            transcendentals=2 * B * C,
            bytes_accessed=2 * B * C * HW * itemsize + 2 * C * hidden * itemsize,
        )
        out_flat = pl.pallas_call(
            kernel,
            out_shape=jax.ShapeDtypeStruct((B, C, HW), x.dtype),
            grid_spec=pltpu.PrefetchScalarGridSpec(
                num_scalar_prefetch=0,
                grid=(B // Bt,),
                in_specs=[
                    pl.BlockSpec((Bt, C, HW), lambda b: (b, 0, 0)),
                    pl.BlockSpec((C, hidden), lambda b: (0, 0)),   # weights VMEM-resident
                    pl.BlockSpec((hidden, C), lambda b: (0, 0)),
                ],
                out_specs=pl.BlockSpec((Bt, C, HW), lambda b: (b, 0, 0)),
            ),
            compiler_params=pltpu.CompilerParams(
                dimension_semantics=("parallel",),
                vmem_limit_bytes=vmem_limit_bytes,
            ),
            cost_estimate=cost,
        )(x_flat, w1t, w2t)
        return out_flat.reshape(B, C, H, W)

    # -------- Variant B: HW-tiled two-pass (Bt = 1) --------
    if hw_tile is None:
        max_hwt = max(128, ((tile_budget // max(1, C * itemsize)) // 128) * 128)
        hw_tile = None
        d = min(max_hwt, (HW // 128) * 128)
        while d >= 128:                      # prefer a lane-dense chunk that divides HW
            if HW % d == 0:
                hw_tile = d
                break
            d -= 128
        if hw_tile is None:                  # no 128-aligned divisor: pad HW up instead
            hw_tile = min(max_hwt, ((HW + 127) // 128) * 128)
    n_hw = pl.cdiv(HW, hw_tile)
    HWp = n_hw * hw_tile
    pad = HWp - HW
    if pad:
        # TODO(synk): fold the pad into a masked edge block to avoid this extra HBM pass.
        x_flat = jnp.pad(x_flat, ((0, 0), (0, 0), (0, pad)))

    kernel = functools.partial(_ca_two_pass_kernel, inv_hw=inv_hw, hw_true=HW,
                               hw_tile=hw_tile, padded=pad > 0)
    cost = pl.CostEstimate(
        flops=3 * B * C * HWp + 8 * B * C * hidden,
        transcendentals=2 * B * C,
        bytes_accessed=3 * B * C * HWp * itemsize + 2 * C * hidden * itemsize,
    )
    out_flat = pl.pallas_call(
        kernel,
        out_shape=jax.ShapeDtypeStruct((B, C, HWp), x.dtype),
        grid_spec=pltpu.PrefetchScalarGridSpec(
            num_scalar_prefetch=0,
            grid=(B, 2, n_hw),               # (batch, phase: 0=pool / 1=scale, HW chunk)
            in_specs=[
                pl.BlockSpec((1, C, hw_tile), lambda b, ph, h: (b, 0, h)),
                pl.BlockSpec((C, hidden), lambda b, ph, h: (0, 0)),
                pl.BlockSpec((hidden, C), lambda b, ph, h: (0, 0)),
            ],
            # Phase 0 parks the (unwritten) output window at chunk 0 -> no garbage
            # writebacks; phase 1 streams the scaled chunks out.
            out_specs=pl.BlockSpec((1, C, hw_tile), lambda b, ph, h: (b, 0, h * ph)),
            scratch_shapes=[
                pltpu.VMEM((1, C), jnp.float32),   # running sum
                pltpu.VMEM((1, C), jnp.float32),   # running max
                pltpu.VMEM((1, C), jnp.float32),   # per-channel scale
            ],
        ),
        compiler_params=pltpu.CompilerParams(
            dimension_semantics=("parallel", "arbitrary", "arbitrary"),
            vmem_limit_bytes=vmem_limit_bytes,
        ),
        cost_estimate=cost,
    )(x_flat, w1t, w2t)
    if pad:
        out_flat = out_flat[:, :, :HW]
    return out_flat.reshape(B, C, H, W)


def reference(x, w1, w2):
    avg = jnp.mean(x, axis=(2, 3))                   # (B, C)
    mx = jnp.max(x, axis=(2, 3))                     # (B, C)

    def mlp(v):
        h = jnp.maximum(v @ w1.T, 0.0)
        return jax.nn.sigmoid(h @ w2.T)

    scale = mlp(avg) + mlp(mx)                       # (B, C)
    return x * scale[:, :, None, None]


if __name__ == "__main__":
    B, C, H, W = 2, 64, 16, 16
    reduction_ratio = 16
    hidden = C // reduction_ratio                    # 4

    key = jax.random.PRNGKey(0)
    kx, k1, k2 = jax.random.split(key, 3)
    x = jax.random.normal(kx, (B, C, H, W), dtype=jnp.float32)
    # PyTorch Linear weight layout: (out_features, in_features), bias=False
    w1 = jax.random.normal(k1, (hidden, C), dtype=jnp.float32) * (1.0 / jnp.sqrt(C))
    w2 = jax.random.normal(k2, (C, hidden), dtype=jnp.float32) * (1.0 / jnp.sqrt(hidden))

    ref = reference(x, w1, w2)

    # Variant A (single-pass, batch-tiled) — the default path for this shape.
    out = jax.block_until_ready(channel_attention(x, w1, w2))
    assert out.shape == (B, C, H, W)
    assert jnp.allclose(out, ref, atol=1e-5, rtol=1e-5), "single-pass mismatch vs reference"

    # Variant B (HW-tiled two-pass) — exercised explicitly to validate the large-map path.
    out2 = jax.block_until_ready(channel_attention(x, w1, w2, two_pass=True, hw_tile=128))
    assert jnp.allclose(out2, ref, atol=1e-5, rtol=1e-5), "two-pass mismatch vs reference"

    print("KERNEL_OK")
</pallas_src>

<mosaic_0001>
module attributes {stable_mosaic.version = 11 : i64} {
  func.func @_ca_single_pass_kernel(%arg0: i32, %arg1: memref<1x64x256xf32, #tpu.memory_space<vmem>>, %arg2: memref<64x4xf32, #tpu.memory_space<vmem>>, %arg3: memref<4x64xf32, #tpu.memory_space<vmem>>, %arg4: memref<1x64x256xf32, #tpu.memory_space<vmem>>) attributes {dimension_semantics = [#tpu.dimension_semantics<parallel>], iteration_bounds = array<i64: 2>, scalar_prefetch = 0 : i64, scratch_operands = 0 : i64, tpu.core_type = #tpu.core_type<tc>, window_params = [{transform_indices = @transform_0, window_bounds = array<i64: 1, 64, 256>}, {pipeline_mode = #tpu.pipeline_mode<synchronous>, transform_indices = @transform_1, window_bounds = array<i64: 64, 4>}, {pipeline_mode = #tpu.pipeline_mode<synchronous>, transform_indices = @transform_2, window_bounds = array<i64: 4, 64>}, {transform_indices = @transform_3, window_bounds = array<i64: 1, 64, 256>}]} {
    %c0 = arith.constant 0 : index
    %c0_0 = arith.constant 0 : index
    %c0_1 = arith.constant 0 : index
    %0 = vector.load %arg1[%c0, %c0_0, %c0_1] : memref<1x64x256xf32, #tpu.memory_space<vmem>>, vector<1x64x256xf32>
    %cst = arith.constant dense<0.000000e+00> : vector<1x64xf32>
    %1 = vector.multi_reduction <add>, %0, %cst [2] : vector<1x64x256xf32> to vector<1x64xf32>
    %cst_2 = arith.constant dense<0xFF800000> : vector<1x64xf32>
    %2 = vector.multi_reduction <maximumf>, %0, %cst_2 [2] : vector<1x64x256xf32> to vector<1x64xf32>
    %cst_3 = arith.constant 3.906250e-03 : f32
    %3 = vector.broadcast %cst_3 : f32 to vector<1x64xf32>
    %4 = arith.mulf %1, %3 : vector<1x64xf32>
    %5 = tpu.concatenate %4, %2 in 0 : vector<1x64xf32>, vector<1x64xf32> -> vector<2x64xf32>
    %c0_4 = arith.constant 0 : index
    %c0_5 = arith.constant 0 : index
    %6 = vector.load %arg2[%c0_4, %c0_5] : memref<64x4xf32, #tpu.memory_space<vmem>>, vector<64x4xf32>
    %cst_6 = arith.constant dense<0.000000e+00> : vector<2x4xf32>
    %7 = tpu.matmul %5, %6, %cst_6 {dimension_numbers = #tpu.dot_dimension_numbers<[1], [0], [0], [1], [0, 0, 1, 1], [], []>} : vector<2x64xf32>, vector<64x4xf32>, vector<2x4xf32> -> vector<2x4xf32>
    %cst_7 = arith.constant 0.000000e+00 : f32
    %8 = vector.broadcast %cst_7 : f32 to vector<2x4xf32>
    %9 = arith.maximumf %7, %8 : vector<2x4xf32>
    %c0_8 = arith.constant 0 : index
    %c0_9 = arith.constant 0 : index
    %10 = vector.load %arg3[%c0_8, %c0_9] : memref<4x64xf32, #tpu.memory_space<vmem>>, vector<4x64xf32>
    %cst_10 = arith.constant dense<0.000000e+00> : vector<2x64xf32>
    %11 = tpu.matmul %9, %10, %cst_10 {dimension_numbers = #tpu.dot_dimension_numbers<[1], [0], [0], [1], [0, 0, 1, 1], [], []>} : vector<2x4xf32>, vector<4x64xf32>, vector<2x64xf32> -> vector<2x64xf32>
    %12 = arith.negf %11 : vector<2x64xf32>
    %13 = math.exp %12 : vector<2x64xf32>
    %cst_11 = arith.constant 1.000000e+00 : f32
    %14 = vector.broadcast %cst_11 : f32 to vector<2x64xf32>
    %15 = arith.addf %14, %13 : vector<2x64xf32>
    %16 = arith.divf %14, %15 : vector<2x64xf32>
    %17 = vector.extract_strided_slice %16 {offsets = [0, 0], sizes = [1, 64], strides = [1, 1]} : vector<2x64xf32> to vector<1x64xf32>
    %18 = vector.extract_strided_slice %16 {offsets = [1, 0], sizes = [1, 64], strides = [1, 1]} : vector<2x64xf32> to vector<1x64xf32>
    %19 = arith.addf %17, %18 : vector<1x64xf32>
    %c0_12 = arith.constant 0 : index
    %c0_13 = arith.constant 0 : index
    %c0_14 = arith.constant 0 : index
    %20 = vector.load %arg1[%c0_12, %c0_13, %c0_14] : memref<1x64x256xf32, #tpu.memory_space<vmem>>, vector<1x64x256xf32>
    %21 = vector.shape_cast %19 : vector<1x64xf32> to vector<1x64x1xf32>
    %22 = vector.broadcast %21 : vector<1x64x1xf32> to vector<1x64x256xf32>
    %23 = arith.mulf %20, %22 : vector<1x64x256xf32>
    %c0_15 = arith.constant 0 : index
    %c0_16 = arith.constant 0 : index
    %c0_17 = arith.constant 0 : index
    %24 = vector.load %arg4[%c0_15, %c0_16, %c0_17] : memref<1x64x256xf32, #tpu.memory_space<vmem>>, vector<1x64x256xf32>
    tpu.vector_store %arg4[%c0_15, %c0_16, %c0_17], %23 {strides = array<i32>} : memref<1x64x256xf32, #tpu.memory_space<vmem>>, vector<1x64x256xf32>,
    return
  }
  func.func @transform_0(%arg0: i32) -> (i32, i32, i32) {
    %c0_i32 = arith.constant 0 : i32
    %c0_i32_0 = arith.constant 0 : i32
    %c0_i32_1 = arith.constant 0 : i32
    return %arg0, %c0_i32, %c0_i32_0 : i32, i32, i32
  }
  func.func @transform_1(%arg0: i32) -> (i32, i32) {
    %c0_i32 = arith.constant 0 : i32
    %c0_i32_0 = arith.constant 0 : i32
    %c0_i32_1 = arith.constant 0 : i32
    return %c0_i32, %c0_i32_0 : i32, i32
  }
  func.func @transform_2(%arg0: i32) -> (i32, i32) {
    %c0_i32 = arith.constant 0 : i32
    %c0_i32_0 = arith.constant 0 : i32
    %c0_i32_1 = arith.constant 0 : i32
    return %c0_i32, %c0_i32_0 : i32, i32
  }
  func.func @transform_3(%arg0: i32) -> (i32, i32, i32) {
    %c0_i32 = arith.constant 0 : i32
    %c0_i32_0 = arith.constant 0 : i32
    %c0_i32_1 = arith.constant 0 : i32
    return %arg0, %c0_i32, %c0_i32_0 : i32, i32, i32
  }
}

</mosaic_0001>

<bundles_post_ra>
// kernel: tpu_custom_call.1
= control target key start
LH: loop header
LB: loop body
LE: loop exit
PB: predicated region body
PF: predicated region fallthrough
CT: control target
= control target key end

     0   :  { %8 = vsyncpa [#allocation3], 0  ;;  %s1463_s0 = inlined_call_operand.hbm [shape: f32[2,64,256], index: 0, kind: input, shape index: {}]   ;;  %s1464_s1 = inlined_call_operand.hbm [shape: f32[64,4], index: 1, kind: input, shape index: {}]   ;;  %s1465_s2 = inlined_call_operand.hbm [shape: f32[4,64], index: 2, kind: input, shape index: {}]   ;;  %s1466_s3 = inlined_call_operand.hbm [shape: f32[2,64,256], index: 3, kind: output, shape index: {}]  }
   0x1   :  { %10 = vsyncpa [#allocation3 + $0x1], 0 }
   0x2   :  { %11 = vsyncpa [#allocation6], 0 }
   0x3   :  { %12 = vsyncpa [#allocation4], 0 }
   0x4   :  { %14 = vsyncpa [#allocation4 + $0x1], 0  ;;  %s1089_s12 = smov 0   ;;  %s1091_s13 = smov 0  }
   0x5   :  { %s1093_s14 = smov 0   ;;  %s1095_s15 = smov 0  }
   0x6 LB: > { %s1110_s16 = sadd.s32 4294967295, %s1054_s15   ;;  %s747_s17 = sadd.s32 4294967294, %s1054_s15   ;;  %s1054_s15 = sphi %s1095_s15, %s1486_s15   ;;  %s1050_s14 = sphi %s1093_s14, %s1485_s14   ;;  %s1046_s13 = sphi %s1091_s13, %s1484_s13   ;;  %s1042_s12 = sphi %s1089_s12, %s1483_s12  }
   0x7   : > { %p40_p0 = scmp.ne.s32.totalorder %s1046_s13, %s1042_s12  ;;  %p1467_p1 = scmp.eq.s32.totalorder %s1110_s16, 0 }
   0x8   : > { %p112_p3 = scmp.eq.s32.totalorder %s747_s17, 1  ;;  %p748_p5 = scmp.ge.s32.totalorder %s1054_s15, 1 }
   0x9   : > { %p1119_p4 = por %p1467_p1, %p40_p0  ;;  %p119_p7 = scmp.lt.s32.totalorder %s1054_s15, 3 }
   0xa   : > { %p1124_p6 = por %p112_p3, %p40_p0  ;;  %s1056_s21 = smov [#allocation5]  }
   0xb   : > { %s1470_s18 = scalar_select %p1119_p4, 1, 0 }
   0xc   : > { %s1471_s19 = scalar_select %p1124_p6, 1, 0 }
   0xd   : > { %p1129_p8 = pnand %p748_p5, %p119_p7  ;;  %s131_s22 = sshll.u32 %s1056_s21, 4  ;;  %s1133_s22 = int_to_ptr.vmem [resolvable:$true] %s131_s22 }
   0xe   : > { %s1057_s24 = smov [#allocation7]   ;;  %s898_s28 = scalar_lea.hbm %s1464_s1, 1024 }
   0xf   : > { %p830_p9 = pneg %p1129_p8  ;;  %s145_s25 = sshll.u32 %s1057_s24, 4  ;;  %s1144_s25 = int_to_ptr.vmem [resolvable:$true] %s145_s25 }
  0x10   : > { %p899_p12 = scmp.ne.s32.totalorder %s1464_s1, %s898_s28  ;;  %p905_p5 = scmp.lt.u32.totalorder %s898_s28, %s1464_s1 }
  0x11   : > { %p1140_p11 = pnand %p830_p9, %p1467_p1 }
  0x13   : > { %p900_p13 = pneg %p1140_p11 }
  0x15   : > { %p901_p0 = pnand %p900_p13, %p899_p12 }
  0x17   : > { %p902_p3 = pneg %p901_p0 }
  0x19   : > { %p907_p7 = pnand %p905_p5, %p902_p3 }
  0x1b   : > { %910 = shalt.err (!%p907_p7)
}
  0x1c   : > { %s911_s6 = scalar_lea.vmem %s1133_s22, 1024  ;;  %p919_p2 = scmp.lt.s32.totalorder %s1133_s22, %s1133_s22 }
  0x1d   : > { %p912_p9 = scmp.ne.s32.totalorder %s1133_s22, %s911_s6  ;;  %p920_p12 = scmp.lt.s32.totalorder %s911_s6, %s911_s6 }
  0x1f   : > { %p914_p10 = pnand %p912_p9, %p900_p13  ;;  %p921_p0 = por %p920_p12, %p919_p2 }
  0x21   : > { %p915_p1 = pneg %p914_p10 }
  0x23   : > { %p922_p6 = pnand %p921_p0, %p915_p1 }
  0x25   : > { %925 = shalt.err (!%p922_p6)
}
  0x26   : > { %s1058_s7 = smov 128   ;;  %s1059_s8 = smov 8  }
  0x27   : > { %833 = dma.hbm_to_vmem [thread:$0]  (!%p1140_p11), %s1464_s1, 1024, %s1133_s22, [#allocation6], %s1058_s7, %s1058_s7, %s1059_s8  }
  0x28   : > { %s926_s21 = scalar_lea.hbm %s1465_s2, 64 }
  0x29   : > { %p927_p2 = scmp.ne.s32.totalorder %s1465_s2, %s926_s21  ;;  %p933_p10 = scmp.lt.u32.totalorder %s926_s21, %s1465_s2 }
  0x2b   : > { %p929_p1 = pnand %p927_p2, %p900_p13 }
  0x2d   : > { %p930_p6 = pneg %p929_p1 }
  0x2f   : > { %p935_p3 = pnand %p933_p10, %p930_p6 }
  0x31   : > { %938 = shalt.err (!%p935_p3)
}
  0x32   : > { %s939_s22 = scalar_lea.vmem %s1144_s25, 64  ;;  %p947_p12 = scmp.lt.s32.totalorder %s1144_s25, %s1144_s25 }
  0x33   : > { %p940_p5 = scmp.ne.s32.totalorder %s1144_s25, %s939_s22  ;;  %p948_p0 = scmp.lt.s32.totalorder %s939_s22, %s939_s22 }
  0x35   : > { %p942_p7 = pnand %p940_p5, %p900_p13  ;;  %p949_p2 = por %p948_p0, %p947_p12 }
  0x37   : > { %p943_p9 = pneg %p942_p7 }
  0x39   : > { %p950_p1 = pnand %p949_p2, %p943_p9 }
  0x3b   : > { %953 = shalt.err (!%p950_p1)
}
  0x3c   : > { %836 = dma.hbm_to_vmem [thread:$0]  (!%p1140_p11), %s1465_s2, 64, %s1144_s25, [#allocation6]  }
  0x3d   : > { %s1199_s4 = sadd.s32 1, %s1054_s15   ;;  %s27_s23 = sadd.s32 1, %s1050_s14 }
  0x3e   : > { %s24_s5 = ssub.s32 %s1054_s15, %s1199_s4  ;;  %p34_p13 = scmp.ne.s32.totalorder %s1050_s14, %s1046_s13 }
  0x3f   : > { %p25_p6 = scmp.eq.s32.totalorder %s24_s5, 0  ;;  %p35_p10 = scmp.eq.s32.totalorder %s1054_s15, 0 }
  0x40   : > { %p1474_p3 = scmp.eq.s32.totalorder %s1110_s16, 1  ;;  %p847_p7 = scmp.lt.s32.totalorder %s1054_s15, 2 }
  0x41   : > { %s1215_s7 = scalar_select %p25_p6, %s1050_s14, %s27_s23  }
  0x42   : > { %p1209_p5 = por %p1474_p3, %p34_p13  ;;  %p36_p9 = por %p35_p10, %p34_p13 }
  0x43   : > { %s156_s8 = sand.u32 1, %s1050_s14   ;;  %s769_s25 = sshll.u32 %s1054_s15, 11 }
  0x44   : > { %s1475_s6 = scalar_select %p1209_p5, 1, 0 }
  0x45   : > { %s752_s9 = sshll.u32 %s156_s8, 7  ;;  %s1222_s17 = scalar_lea.hbm %s1463_s0, %s769_s25 }
  0x46   : > { %s160_s21 = scalar_lea.vmem [#allocation2], %s752_s9  ;;  %p1226_p11 = pnand %p847_p7, %p36_p9 }
  0x47   : > { %s167_s24 = sshll.u32 %s160_s21, 4  ;;  %s1230_s27 = scalar_lea.sflag [#allocation3], %s156_s8  ;;  %s1224_s24 = int_to_ptr.vmem [resolvable:$true] %s167_s24 }
  0x48   : > { %s954_s28 = scalar_lea.hbm %s1222_s17, 2048  ;;  %p956_p0 = pneg %p1226_p11 }
  0x49   : > { %p955_p12 = scmp.ne.s32.totalorder %s1222_s17, %s954_s28  ;;  %s959_s30 = scalar_lea.hbm %s1463_s0, 4096 }
  0x4a   : > { %p960_p13 = scmp.lt.u32.totalorder %s1222_s17, %s1463_s0  ;;  %p961_p6 = scmp.lt.u32.totalorder %s959_s30, %s954_s28 }
  0x4b   : > { %p957_p2 = pnand %p956_p0, %p955_p12  ;;  %p963_p3 = scmp.lt.u32.totalorder %s954_s28, %s1222_s17 }
  0x4c   : > { %p962_p10 = por %p961_p6, %p960_p13 }
  0x4d   : > { %p958_p1 = pneg %p957_p2 }
  0x4e   : > { %p964_p7 = por %p963_p3, %p962_p10 }
  0x50   : > { %p965_p9 = pnand %p964_p7, %p958_p1 }
  0x52   : > { %968 = shalt.err (!%p965_p9)
}
  0x53   : > { %s969_s8 = scalar_lea.vmem %s1224_s24, 2048  ;;  %s1060_s9 = smov [#allocation2]  }
  0x54   : > { %p970_p12 = scmp.ne.s32.totalorder %s1224_s24, %s969_s8  ;;  %s974_s25 = sshll.u32 %s1060_s9, 4  ;;  %s975_s25 = int_to_ptr.vmem [resolvable:$false] %s974_s25 }
  0x55   : > { %s976_s10 = scalar_lea.vmem %s975_s25, 4096  ;;  %p977_p4 = scmp.lt.s32.totalorder %s1224_s24, %s975_s25 }
  0x56   : > { %p972_p2 = pnand %p970_p12, %p956_p0  ;;  %p978_p13 = scmp.lt.s32.totalorder %s976_s10, %s969_s8 }
  0x58   : > { %p973_p5 = pneg %p972_p2  ;;  %p979_p6 = por %p978_p13, %p977_p4 }
  0x5a   : > { %p980_p10 = pnand %p979_p6, %p973_p5 }
  0x5c   : > { %983 = shalt.err (!%p980_p10)
}
  0x5d   : > { %s1061_s11 = smov 256   ;;  %s1062_s21 = smov 16  }
  0x5e   : > { %840 = dma.hbm_to_vmem [thread:$0]  (!%p1226_p11), %s1222_s17, 2048, %s1224_s24, %s1230_s27, %s1061_s11, %s1061_s11, %s1062_s21  }
  0x5f   : > { %179 = sbr.rel (%p1129_p8) target bundleno = 891 (0x37b), region = 32  ;;  %s1261_s28 = sand.u32 (!%p1129_p8), 1, %s1046_s13  }
  0x60   : > { %s756_s22 = sshll.u32 (!%p1129_p8), %s1261_s28, 7  ;;  %s182_s29 = scalar_lea.sflag (!%p1129_p8), [#allocation3], %s1261_s28 }
  0x61   : > { %s1267_s30 = scalar_lea.vmem (!%p1129_p8), [#allocation2], %s756_s22  ;;  %p1477_p4 = scmp.ne.s32.totalorder (!%p1129_p8), %s1470_s18, 0 }
  0x66   : > { %1029 = dma.done.wait (%p1477_p4), %s182_s29, 2048  }
  0x67   : > { %1031 = vsyncadd (%p1477_p4), %s182_s29, 4294965248  ;;  %p1478_p5 = scmp.eq.s32.totalorder %s1110_s16, 0 }
  0x69   : > { %1033 = dma.done.wait (%p1478_p5), [#allocation6], 1088   ;;  %p1479_p8 = pmov %p1478_p5 }
  0x6a   : > { %v1278_v0 = vld [vmem:[%s1267_s30 + $0x20] sm:$0xff]  ;;  %v1281_v1 = vld [vmem:[%s1267_s30 + $0x28] sm:$0xff]  ;;  %v1292_v5 = vld [vmem:[%s1267_s30 + $0x30] sm:$0xff]  ;;  %v1063_v35 = vmov 0.0|0.0   ;;  %vm1064_vm0 = vmmov 0   ;;  %v1065_v45 = vmov 0.0   ;;  %v296_v49 = vlaneseq }
  0x6b   : > { %1035 = vsyncadd (%p1479_p8), [#allocation6], 4294966208  ;;  %v1284_v2 = vld [vmem:[%s1267_s30] sm:$0xff]  ;;  %v238_v3 = vadd.f32 %v1281_v1, %v1278_v0  ;;  %v1289_v4 = vld [vmem:[%s1267_s30 + $0x8] sm:$0xff]  ;;  %v262_v16 = vmax.f32 %v1278_v0, %v1281_v1  ;;  %806 = vmatprep.subr.bf16.mxu0 %v1063_v35  ;;  %798 = vmatprep.mubr.msk.f32.mxu0 %vm1064_vm0, %v1065_v45  ;;  %vm307_vm1 = vcmask 130112   ;;  %vm314_vm2 = vcmask 195712  }
  0x6c   : > { %v1295_v6 = vld [vmem:[%s1267_s30 + $0x38] sm:$0xff]  ;;  %v232_v7 = vadd.f32 %v1289_v4, %v1284_v2  ;;  %v1300_v8 = vld [vmem:[%s1267_s30 + $0x10] sm:$0xff]  ;;  %v256_v13 = vmax.f32 %v1284_v2, %v1289_v4  ;;  %v1314_v14 = vld [vmem:[%s1267_s30 + $0x40] sm:$0xff]  ;;  %801 = vmatprep.subr.mxu1 %v1065_v45  ;;  %803 = vmatprep.mubr.msk.f32.mxu1 %vm1064_vm0, %v1065_v45  ;;  %v297_v52 = vand.u32 127, %v296_v49  ;;  %v1357_v56 = vshrl.u32 %v296_v49, 7  ;;  %s1382_s18 = scalar_lea.vmem [#allocation8], %s756_s22 }
  0x6d   : > { %v1303_v9 = vld [vmem:[%s1267_s30 + $0x18] sm:$0xff]  ;;  %239 = vadd.xlane.f32.xlu1 %v238_v3  ;;  %v241_v10 = vadd.f32 %v1295_v6, %v1292_v5  ;;  %v1317_v15 = vld [vmem:[%s1267_s30 + $0x48] sm:$0xff]  ;;  %v1324_v18 = vld [vmem:[%s1267_s30 + $0x50] sm:$0xff]  ;;  %v265_v20 = vmax.f32 %v1292_v5, %v1295_v6  ;;  %vm321_vm3 = vcmask 261312   ;;  %vm328_vm4 = vcmask 326912   ;;  %s770_s20 = sshll.u32 %s1110_s16, 11 }
  0x6e   : > { %233 = vadd.xlane.f32.xlu0 %v232_v7  ;;  %v235_v11 = vadd.f32 %v1303_v9, %v1300_v8  ;;  %v259_v12 = vmax.f32 %v1300_v8, %v1303_v9  ;;  %v244_v17 = vadd.f32 %v1317_v15, %v1314_v14  ;;  %v1327_v19 = vld [vmem:[%s1267_s30 + $0x58] sm:$0xff]  ;;  %v1334_v22 = vld [vmem:[%s1267_s30 + $0x60] sm:$0xff]  ;;  %v1337_v23 = vld [vmem:[%s1267_s30 + $0x68] sm:$0xff]  ;;  %v268_v24 = vmax.f32 %v1314_v14, %v1317_v15  ;;  %s655_s17 = sshll.u32 %s1382_s18, 4  ;;  %s1413_s27 = scalar_lea.hbm %s1466_s3, %s770_s20  ;;  %s1415_s17 = int_to_ptr.vmem [resolvable:$true] %s655_s17 }
  0x6f   : > { %v247_v21 = vadd.f32 %v1327_v19, %v1324_v18  ;;  %v250_v25 = vadd.f32 %v1337_v23, %v1334_v22  ;;  %v1344_v26 = vld [vmem:[%s1267_s30 + $0x70] sm:$0xff]  ;;  %v1347_v27 = vld [vmem:[%s1267_s30 + $0x78] sm:$0xff]  ;;  %v271_v28 = vmax.f32 %v1324_v18, %v1327_v19  ;;  %v274_v31 = vmax.f32 %v1334_v22, %v1337_v23  ;;  %v402_v32 = vld [vmem:[#allocation5] sm:$0xff]  ;;  %s642_s16 = scalar_lea.sflag [#allocation4], %s1261_s28  ;;  %s984_s23 = scalar_lea.vmem %s1415_s17, 2048 }
  0x70   : > { %v253_v29 = vadd.f32 %v1347_v27, %v1344_v26  ;;  %v277_v30 = vmax.f32 %v1344_v26, %v1347_v27  ;;  %v403_v33 = vld [vmem:[#allocation5 + $0x8] sm:$0xff]  ;;  %v404_v36 = vld [vmem:[#allocation5 + $0x10] sm:$0xff]  ;;  %v405_v37 = vld [vmem:[#allocation5 + $0x18] sm:$0xff]  ;;  %v302_v54 = vadd.s32 4294967288, %v297_v52  ;;  %v309_v60 = vadd.s32 4294967280, %v297_v52  ;;  %p985_p11 = scmp.ne.s32.totalorder %s1415_s17, %s984_s23  ;;  %p1480_p0 = scmp.ne.s32.totalorder %s1475_s6, 0 }
  0x71   : > { %242 = vadd.xlane.f32.xlu1 %v241_v10  ;;  %v807_v34 = vpack.c.bf16 %v403_v33, %v402_v32  ;;  %v810_v38 = vpack.c.bf16 %v405_v37, %v404_v36  ;;  %v406_v39 = vld [vmem:[#allocation5 + $0x20] sm:$0xff]  ;;  %v407_v40 = vld [vmem:[#allocation5 + $0x28] sm:$0xff]  ;;  %v408_v42 = vld [vmem:[#allocation5 + $0x30] sm:$0xff]  ;;  %v300_v62 = vsub.s32 %v297_v52, %v1357_v56  ;;  %v316_v3 = vadd.s32 4294967272, %v297_v52  ;;  %s1066_s5 = smov [#allocation8]  }
  0x72   : > { %236 = vadd.xlane.f32.xlu0 %v235_v11  ;;  %v813_v41 = vpack.c.bf16 %v407_v40, %v406_v39  ;;  %v409_v43 = vld [vmem:[#allocation5 + $0x38] sm:$0xff]  ;;  %v305_v58 = vsub.s32 %v302_v54, %v1357_v56  ;;  %v323_v10 = vadd.s32 4294967264, %v297_v52  ;;  %v330_v11 = vadd.s32 4294967256, %v297_v52  ;;  %p986_p1 = pnand %p985_p11, %p1480_p0  ;;  %s988_s8 = sshll.u32 %s1066_s5, 4  ;;  %s989_s8 = int_to_ptr.vmem [resolvable:$false] %s988_s8 }
  0x73   : > { %808 = vmatpush3.bf16.msra.mxu0 %v807_v34  ;;  %v816_v44 = vpack.c.bf16 %v409_v43, %v408_v42  ;;  %vm335_vm5 = vcmask 392512   ;;  %vm342_vm6 = vcmask 458112   ;;  %vm349_vm7 = vcmask 523712   ;;  %s990_s9 = scalar_lea.vmem %s989_s8, 4096  ;;  %p991_p7 = scmp.lt.s32.totalorder %s1415_s17, %s989_s8 }
  0x74   : > { %809 = vmatprep.subr.bf16.mxu0 %v1063_v35  ;;  %v333_v32 = vsub.s32 %v330_v11, %v1357_v56  ;;  %vm400_vm8 = vcmask 1040384   ;;  %vm410_vm9 = vcmask 523264   ;;  %vm490_vm10 = vcmask 1043456   ;;  %p987_p3 = pneg %p986_p1  ;;  %p992_p9 = scmp.lt.s32.totalorder %s990_s9, %s984_s23 }
  0x75   : > { %260 = vmax.xlane.f32.xlu1 %v259_v12  ;;  %vm486_vm11 = vcmask 31744  }
  0x76   : > { %257 = vmax.xlane.f32.xlu0 %v256_v13  ;;  %v312_v13 = vsub.s32 %v309_v60, %v1357_v56  ;;  %p993_p12 = por %p992_p9, %p991_p7 }
  0x77   : > { %811 = vmatpush3.bf16.msra.mxu0 %v810_v38 }
  0x78   : > { %812 = vmatprep.subr.bf16.mxu0 %v1063_v35  ;;  %p994_p2 = pnand %p993_p12, %p987_p3 }
  0x79   : > { %263 = vmax.xlane.f32.xlu1 %v262_v16 }
  0x7a   : > { %245 = vadd.xlane.f32.xlu0 %v244_v17 }
  0x7b   : > { %814 = vmatpush3.bf16.msra.mxu0 %v813_v41 }
  0x7c   : > { %815 = vmatprep.subr.bf16.mxu0 %v1063_v35 }
  0x7d   : > { %266 = vmax.xlane.f32.xlu1 %v265_v20  ;;  %v337_v20 = vadd.s32 4294967248, %v297_v52 }
  0x7e   : > { %248 = vadd.xlane.f32.xlu0 %v247_v21 }
  0x7f   : > { %817 = vmatpush3.bf16.msra.mxu0 %v816_v44  ;;  %v340_v39 = vsub.s32 %v337_v20, %v1357_v56  ;;  %v485_v20 = vld [vmem:[#allocation7] sm:$0xf] }
  0x80   : > { %802 = vmatpush3.msk.msra.mxu1 %vm490_vm10, %v485_v20 }
  0x81   : > { %269 = vmax.xlane.f32.xlu1 %v268_v24  ;;  %v319_v24 = vsub.s32 %v316_v3, %v1357_v56 }
  0x82   : > { %251 = vadd.xlane.f32.xlu0 %v250_v25 }
  0x85   : > { %272 = vmax.xlane.f32.xlu1 %v271_v28 }
  0x86   : > { %254 = vadd.xlane.f32.xlu0 %v253_v29  ;;  %v344_v29 = vadd.s32 4294967240, %v297_v52 }
  0x88   : > { %v347_v44 = vsub.s32 %v344_v29, %v1357_v56 }
  0x89   : > { %278 = vmax.xlane.f32.xlu1 %v277_v30  ;;  %v326_v30 = vsub.s32 %v323_v10, %v1357_v56 }
  0x8a   : > { %275 = vmax.xlane.f32.xlu0 %v274_v31 }
  0xfa   : > { %v240_v46 = vpop.xlane.xlu1 %239 }
  0xfb   : > { %v234_v47 = vpop.xlane.xlu0 %233  ;;  %v282_v16 = vmul.f32 0.00390625, %v240_v46 }
  0xfc   : > { %v280_v63 = vmul.f32 0.00390625, %v234_v47 }
  0xfd   : > { %v313_v37 = vrot.slane %v282_v16, %v312_v13 }
  0xfe   : > { %v243_v48 = vpop.xlane.xlu1 %242  ;;  %v301_v21 = vrot.slane %v280_v63, %v300_v62 }
  0xff   : > { %v237_v50 = vpop.xlane.xlu0 %236  ;;  %v283_v25 = vmul.f32 0.00390625, %v243_v48 }
 0x100   : > { %v281_v59 = vmul.f32 0.00390625, %v237_v50 }
 0x101   : > { %v320_v42 = vrot.slane %v283_v25, %v319_v24 }
 0x102   : > { %v261_v51 = vpop.xlane.xlu1 %260  ;;  %v306_v12 = vrot.slane %v281_v59, %v305_v58 }
 0x103   : > { %v258_v53 = vpop.xlane.xlu0 %257  ;;  %v367_v34 = vrot.slane %v261_v51, %v305_v58 }
 0x104   : > { %v308_v33 = vsel %vm307_vm1, %v306_v12, %v301_v21  ;;  %v363_v35 = vrot.slane %v258_v53, %v300_v62 }
 0x105   : > { %v315_v46 = vsel %vm314_vm2, %v313_v37, %v308_v33 }
 0x106   : > { %v264_v55 = vpop.xlane.xlu1 %263  ;;  %v368_v50 = vsel %vm307_vm1, %v367_v34, %v363_v35  ;;  %v576_v35 = vsub.s32 0, %v1357_v56 }
 0x107   : > { %v246_v57 = vpop.xlane.xlu0 %245  ;;  %v372_v38 = vrot.slane %v264_v55, %v312_v13 }
 0x108   : > { %v284_v31 = vmul.f32 0.00390625, %v246_v57  ;;  %v322_v57 = vsel %vm321_vm3, %v320_v42, %v315_v46 }
 0x109   : > { %v373_v53 = vsel %vm314_vm2, %v372_v38, %v368_v50 }
 0x10a   : > { %v267_v61 = vpop.xlane.xlu1 %266  ;;  %v327_v47 = vrot.slane %v284_v31, %v326_v30 }
 0x10b   : > { %v249_v7 = vpop.xlane.xlu0 %248  ;;  %v377_v43 = vrot.slane %v267_v61, %v319_v24 }
 0x10c   : > { %v285_v36 = vmul.f32 0.00390625, %v249_v7  ;;  %v329_v62 = vsel %vm328_vm4, %v327_v47, %v322_v57 }
 0x10d   : > { %v378_v58 = vsel %vm321_vm3, %v377_v43, %v373_v53 }
 0x10e   : > { %v270_v17 = vpop.xlane.xlu1 %269  ;;  %v334_v51 = vrot.slane %v285_v36, %v333_v32 }
 0x10f   : > { %v252_v28 = vpop.xlane.xlu0 %251  ;;  %v382_v48 = vrot.slane %v270_v17, %v326_v30 }
 0x110   : > { %v286_v40 = vmul.f32 0.00390625, %v252_v28  ;;  %v336_v7 = vsel %vm335_vm5, %v334_v51, %v329_v62 }
 0x111   : > { %v383_v63 = vsel %vm328_vm4, %v382_v48, %v378_v58 }
 0x112   : > { %v273_v41 = vpop.xlane.xlu1 %272  ;;  %v341_v54 = vrot.slane %v286_v40, %v340_v39 }
 0x113   : > { %v255_v45 = vpop.xlane.xlu0 %254  ;;  %v387_v52 = vrot.slane %v273_v41, %v333_v32 }
 0x114   : > { %v287_v49 = vmul.f32 0.00390625, %v255_v45  ;;  %v343_v11 = vsel %vm342_vm6, %v341_v54, %v336_v7 }
 0x115   : > { %v388_v10 = vsel %vm335_vm5, %v387_v52, %v383_v63 }
 0x116   : > { %v279_v55 = vpop.xlane.xlu1 %278  ;;  %v348_v59 = vrot.slane %v287_v49, %v347_v44 }
 0x117   : > { %v276_v60 = vpop.xlane.xlu0 %275  ;;  %v397_v61 = vrot.slane %v279_v55, %v347_v44 }
 0x118   : > { %v392_v3 = vrot.slane %v276_v60, %v340_v39  ;;  %v350_v16 = vsel %vm349_vm7, %v348_v59, %v343_v11 }
 0x11a   : > { %v393_v12 = vsel %vm342_vm6, %v392_v3, %v388_v10 }
 0x11b   : > { %v398_v13 = vsel %vm349_vm7, %v397_v61, %v393_v12 }
 0x11c   : > { %v401_v17 = vsel %vm400_vm8, %v350_v16, %v398_v13 }
 0x11d   : > { %799 = vmatmul.mubr.msk.f32.vlgmr.msra.gmra.mrb[0].mxu0 %vm410_vm9, %v401_v17 }
 0x1f0   : > { %v480_v21 = vpop.f32.mrb[0].mxu0 }
 0x1f1   : > { %v484_v24 = vmax.f32 %v480_v21, 0.0  ;;  %v800_v25 = vpop.f32.mrb[1].mxu0 }
 0x1f3   : > { %804 = vmatmul.mubr.msk.f32.vlgmr.msra.gmra.mrb[0].mxu1 %vm486_vm11, %v484_v24 }
 0x2c6   : > { %v560_v28 = vpop.f32.mrb[0].mxu1 }
 0x2c7   : > { %v763_v29 = vmul.f32 -1.442695, %v560_v28  ;;  %v805_v30 = vpop.f32.mrb[1].mxu1 }
 0x2c9   : > { %894 = vpow2.f32 %v763_v29 }
 0x2d3   : > { %v895_v31 = vpop.eup %894 }
 0x2d4   : > { %v567_v32 = vadd.f32 1.0, %v895_v31 }
 0x2d6   : > { %896 = vrcp.f32 %v567_v32 }
 0x2e0   : > { %v897_v33 = vpop.eup %896 }
 0x2e1   : > { %v571_v34 = vrot.slane %v897_v33, 1 }
 0x2e3   : > { %v573_v36 = vadd.f32 %v897_v33, %v571_v34 }
 0x2e5   : > { %v577_v37 = vrot.slane %v573_v36, %v576_v35 }
 0x2e7   : > { %583 = vbcast.lane.b32.xlu1 %v577_v37, 264  ;;  %579 = vbcast.lane.b32.xlu0 %v577_v37, 256 }
 0x2eb   : > { %587 = vbcast.lane.b32.xlu1 %v577_v37, 272  ;;  %595 = vbcast.lane.b32.xlu0 %v577_v37, 288 }
 0x2ef   : > { %591 = vbcast.lane.b32.xlu1 %v577_v37, 280  ;;  %603 = vbcast.lane.b32.xlu0 %v577_v37, 304 }
 0x2f3   : > { %599 = vbcast.lane.b32.xlu1 %v577_v37, 296 }
 0x2f7   : > { %607 = vbcast.lane.b32.xlu1 %v577_v37, 312 }
 0x359   : > { %v584_v38 = vpop.permute.xlu1 %583  ;;  %v580_v39 = vpop.permute.xlu0 %579 }
 0x35a   : > { %v611_v40 = vmul.f32 %v584_v38, %v1300_v8  ;;  %v612_v41 = vmul.f32 %v584_v38, %v1303_v9  ;;  %v609_v42 = vmul.f32 %v580_v39, %v1284_v2  ;;  %v610_v56 = vmul.f32 %v580_v39, %v1289_v4 }
 0x35c   : > { %627 = vst [vmem:[%s1382_s18 + $0x10] sm:$0xff] %v611_v40  ;;  %628 = vst [vmem:[%s1382_s18 + $0x18] sm:$0xff] %v612_v41 }
 0x35d   : > { %625 = vst [vmem:[%s1382_s18] sm:$0xff] %v609_v42  ;;  %626 = vst [vmem:[%s1382_s18 + $0x8] sm:$0xff] %v610_v56  ;;  %v588_v8 = vpop.permute.xlu1 %587  ;;  %v596_v2 = vpop.permute.xlu0 %595 }
 0x35e   : > { %v613_v4 = vmul.f32 %v588_v8, %v1278_v0  ;;  %v614_v9 = vmul.f32 %v588_v8, %v1281_v1  ;;  %v617_v43 = vmul.f32 %v596_v2, %v1314_v14  ;;  %v618_v44 = vmul.f32 %v596_v2, %v1317_v15 }
 0x360   : > { %629 = vst [vmem:[%s1382_s18 + $0x20] sm:$0xff] %v613_v4  ;;  %630 = vst [vmem:[%s1382_s18 + $0x28] sm:$0xff] %v614_v9 }
 0x361   : > { %633 = vst [vmem:[%s1382_s18 + $0x40] sm:$0xff] %v617_v43  ;;  %634 = vst [vmem:[%s1382_s18 + $0x48] sm:$0xff] %v618_v44  ;;  %v592_v45 = vpop.permute.xlu1 %591  ;;  %v604_v46 = vpop.permute.xlu0 %603 }
 0x362   : > { %v615_v0 = vmul.f32 %v592_v45, %v1292_v5  ;;  %v616_v47 = vmul.f32 %v592_v45, %v1295_v6  ;;  %v621_v1 = vmul.f32 %v604_v46, %v1334_v22  ;;  %v622_v14 = vmul.f32 %v604_v46, %v1337_v23 }
 0x364   : > { %631 = vst [vmem:[%s1382_s18 + $0x30] sm:$0xff] %v615_v0  ;;  %632 = vst [vmem:[%s1382_s18 + $0x38] sm:$0xff] %v616_v47 }
 0x365   : > { %637 = vst [vmem:[%s1382_s18 + $0x60] sm:$0xff] %v621_v1  ;;  %638 = vst [vmem:[%s1382_s18 + $0x68] sm:$0xff] %v622_v14  ;;  %v600_v15 = vpop.permute.xlu1 %599 }
 0x366   : > { %v619_v48 = vmul.f32 %v600_v15, %v1324_v18  ;;  %v620_v49 = vmul.f32 %v600_v15, %v1327_v19 }
 0x368   : > { %635 = vst [vmem:[%s1382_s18 + $0x50] sm:$0xff] %v619_v48  ;;  %636 = vst [vmem:[%s1382_s18 + $0x58] sm:$0xff] %v620_v49 }
 0x369   : > { %v608_v5 = vpop.permute.xlu1 %607 }
 0x36a   : > { %v623_v6 = vmul.f32 %v608_v5, %v1344_v26  ;;  %v624_v18 = vmul.f32 %v608_v5, %v1347_v27 }
 0x36c   : > { %639 = vst [vmem:[%s1382_s18 + $0x70] sm:$0xff] %v623_v6  ;;  %640 = vst [vmem:[%s1382_s18 + $0x78] sm:$0xff] %v624_v18 }
 0x36d   : > { %997 = shalt.err (!%p994_p2)
}
 0x36e   : > { %s998_s25 = scalar_lea.hbm %s1413_s27, 2048  ;;  %s1002_s21 = scalar_lea.hbm %s1466_s3, 4096 }
 0x36f   : > { %p999_p13 = scmp.ne.s32.totalorder %s1413_s27, %s998_s25  ;;  %p1003_p4 = scmp.lt.u32.totalorder %s1413_s27, %s1466_s3 }
 0x370   : > { %p1004_p5 = scmp.lt.u32.totalorder %s1002_s21, %s998_s25  ;;  %p1006_p11 = scmp.lt.u32.totalorder %s998_s25, %s1413_s27 }
 0x371   : > { %p1000_p6 = pnand %p999_p13, %p1480_p0 }
 0x372   : > { %p1005_p8 = por %p1004_p5, %p1003_p4 }
 0x373   : > { %p1001_p10 = pneg %p1000_p6 }
 0x374   : > { %p1007_p1 = por %p1006_p11, %p1005_p8 }
 0x376   : > { %p1008_p3 = pnand %p1007_p1, %p1001_p10 }
 0x378   : > { %1011 = shalt.err (!%p1008_p3)
}
 0x379   : > { %s1067_s30 = smov 256   ;;  %s1068_s18 = smov 16  }
 0x37a   : > { %828 = dma.vmem_to_hbm [thread:$0]  (%p1480_p0), %s1415_s17, 2048, %s1413_s27, %s642_s16, %s1067_s30, %s1067_s30, %s1068_s18  }
 0x37b PF: > { %s670_s20 = sand.u32 1, %s1042_s12   ;;  %p1481_p7 = scmp.ne.s32.totalorder %s1471_s19, 0 }
 0x37c   : > { %p1482_p9 = scmp.ge.s32.totalorder %s1054_s15, 2  ;;  %s671_s24 = scalar_lea.sflag [#allocation4], %s670_s20 }
 0x37e   : > { %p842_p12 = pnand %p1482_p9, %p1481_p7 }
 0x380   : > { %1037 = dma.done.wait (!%p842_p12), %s671_s24, 2048  }
 0x381   : > { %1039 = vsyncadd (!%p842_p12), %s671_s24, 4294965248  ;;  %p17_p2 = scmp.ge.s32.totalorder %s1199_s4, 4   ;;  %s1483_s12 = smov %s1046_s13 }
 0x382   : > { %s1484_s13 = smov %s1050_s14  ;;  %s1485_s14 = smov %s1215_s7 }
 0x383   : > { %s1486_s15 = smov %s1199_s4  ;;  %19 = sbr.rel (!%p17_p2) target bundleno = 6 (0x6), region = 85 }
 0x38a   :  { %676 = vsyncpa [#allocation3], 1 }
 0x38b   :  { %678 = vsyncpa [#allocation3 + $0x1], 1 }
 0x38c   :  { %679 = vsyncpa [#allocation6], 1 }
 0x38d   :  { %680 = vsyncpa [#allocation4], 1 }
 0x38e   :  { %682 = vsyncpa [#allocation4 + $0x1], 1 }

</bundles_post_ra>
